<compile_context>
chip_gen: v5e
topology: v5e:2x2
jax: 0.10.0
libtpu: 0.0.40
codegen_flags: <defaults>
</compile_context>

<pallas_src>
import jax
import jax.numpy as jnp
from jax.experimental import pallas as pl
from jax.experimental.pallas import tpu as pltpu

_LANE = 128


def _cdiv(a: int, b: int) -> int:
    return -(-a // b)


def _round_up(n: int, m: int) -> int:
    return _cdiv(n, m) * m


def _sublane_multiple(dtype) -> int:
    # Packed sublane tile: f32 -> 8, bf16/f16 -> 16, 8-bit -> 32.
    return {4: 8, 2: 16, 1: 32}.get(jnp.dtype(dtype).itemsize, 8)


def _pick_feature_tile(dim_p: int, max_tile: int = 512) -> int:
    """Largest multiple-of-128 tile <= max_tile dividing the padded dim.

    Dividing exactly guarantees no partial blocks ever touch the contraction
    axis (partial-block garbage on a reduction axis would corrupt the sum).
    """
    for cand in (512, 384, 256, 128):
        if cand <= max_tile and dim_p % cand == 0:
            return cand
    return dim_p  # unreachable for dim_p a multiple of 128


# --------------------------------------------------------------------------
# Kernels
# --------------------------------------------------------------------------
def _linear_single_block_kernel(x_ref, wt_ref, b_ref, o_ref):
    # Whole problem resident in VMEM: one MXU matmul, f32 accumulation,
    # single cast on the final store.  Weight arrives pre-transposed.
    y = jnp.dot(x_ref[...], wt_ref[...], preferred_element_type=jnp.float32)
    o_ref[...] = (y + b_ref[...].astype(jnp.float32)).astype(o_ref.dtype)


def _linear_tiled_kernel(x_ref, wt_ref, b_ref, o_ref, acc_ref):
    # grid = (row tiles, out-col tiles, contraction tiles); reduction last.
    k = pl.program_id(2)

    @pl.when(k == 0)
    def _():
        acc_ref[...] = jnp.zeros_like(acc_ref)

    acc_ref[...] += jnp.dot(x_ref[...], wt_ref[...],
                            preferred_element_type=jnp.float32)

    @pl.when(k == pl.num_programs(2) - 1)
    def _():
        o_ref[...] = (acc_ref[...] + b_ref[...].astype(jnp.float32)
                      ).astype(o_ref.dtype)


# --------------------------------------------------------------------------
# Wrapper (forward pass of ModuleWithMetaclass)
# --------------------------------------------------------------------------
def module_with_metaclass_forward(x, weight, bias, *, compute_dtype=None):
    """y = x @ weight.T + bias (nn.Linear with a square weight)."""
    # __post_init__ semantics (host-side metaclass hook): weight must be square.
    # TODO(synk): the AddPostInit metaclass itself is Python class machinery
    # with no device-side equivalent; only its shape check is reproduced here.
    if weight.shape[-1] != weight.shape[-2]:
        raise ValueError("Weight matrix must be square!")

    out_dtype = x.dtype
    lead_shape = x.shape[:-1]
    D_in = x.shape[-1]
    D_out = weight.shape[0]
    x2 = x.reshape(-1, D_in)
    B = x2.shape[0]

    # Optional low-precision MXU path (bf16 on v6e/v7x); accumulation stays f32.
    if compute_dtype is not None:
        x2 = x2.astype(compute_dtype)
        weight = weight.astype(compute_dtype)

    in_dtype = x2.dtype
    in_isz = jnp.dtype(in_dtype).itemsize
    out_isz = jnp.dtype(out_dtype).itemsize
    sub = _sublane_multiple(in_dtype)

    D_in_p = _round_up(D_in, _LANE)
    D_out_p = _round_up(D_out, _LANE)

    # Pre-transpose the weight ONCE in the wrapper -> kernel contracts with a
    # plain `x @ w` (no in-kernel `.T` / XLU traffic); pad params lane-dense.
    # Zero padding is exact: padded rows/cols contribute zeros, sliced off.
    w_t = weight.T
    if (D_in_p, D_out_p) != (D_in, D_out):
        w_t = jnp.pad(w_t, ((0, D_in_p - D_in), (0, D_out_p - D_out)))
    b_row = bias.reshape(1, D_out)
    if D_out_p != D_out:
        b_row = jnp.pad(b_row, ((0, 0), (0, D_out_p - D_out)))

    flops = 2 * B * D_in * D_out
    bytes_accessed = (B * D_in * in_isz + D_in * D_out * in_isz
                      + D_out * 4 + B * D_out * out_isz)
    cost = pl.CostEstimate(flops=flops, transcendentals=0,
                           bytes_accessed=bytes_accessed)

    # ---------------- tiny path: everything fits comfortably in VMEM --------
    B_p = _round_up(B, sub)
    tiny_bytes = ((B_p * D_in_p + D_in_p * D_out_p) * in_isz
                  + D_out_p * 4
                  + B_p * D_out_p * max(out_isz, 4))
    if tiny_bytes <= (4 << 20):
        x_p = x2
        if (B_p, D_in_p) != (B, D_in):
            x_p = jnp.pad(x2, ((0, B_p - B), (0, D_in_p - D_in)))
        limit = int(min(max(2 * tiny_bytes + (4 << 20), 32 << 20), 56 << 20))
        y_p = pl.pallas_call(
            _linear_single_block_kernel,
            out_shape=jax.ShapeDtypeStruct((B_p, D_out_p), out_dtype),
            in_specs=[
                pl.BlockSpec(memory_space=pltpu.MemorySpace.VMEM),
                pl.BlockSpec(memory_space=pltpu.MemorySpace.VMEM),
                pl.BlockSpec(memory_space=pltpu.MemorySpace.VMEM),
            ],
            out_specs=pl.BlockSpec(memory_space=pltpu.MemorySpace.VMEM),
            compiler_params=pltpu.CompilerParams(vmem_limit_bytes=limit),
            cost_estimate=cost,
        )(x_p, w_t, b_row)
        return y_p[:B, :D_out].reshape(*lead_shape, D_out)

    # ------------- general path: tiled matmul grid, streamed weight ---------
    tn = _pick_feature_tile(D_out_p)
    tk = _pick_feature_tile(D_in_p)
    n_j = D_out_p // tn
    n_k = D_in_p // tk

    # Batch tile from a conservative VMEM budget (double-buffered x/out tiles,
    # double-buffered weight tile, f32 accumulator scratch). 40 MiB keeps
    # comfortable headroom even on v7x's 64 MiB/TC.
    vmem_budget = 40 << 20
    fixed_bytes = 2 * tk * tn * in_isz + 2 * tn * 4
    per_row_bytes = 2 * tk * in_isz + 2 * tn * out_isz + tn * 4
    tm_max = (vmem_budget - fixed_bytes) // per_row_bytes
    tm_max = max(sub, min(2048, (tm_max // sub) * sub))

    n_i = _cdiv(B, tm_max)
    # Guarantee >=2 parallel grid steps when there is enough work so both
    # TensorCores (v7x megacore) get a balanced share instead of one core
    # chewing on a mostly-padded block.
    if n_i * n_j < 2 and B >= 2 * sub:
        n_i = 2
    tm = _round_up(_cdiv(B, n_i), sub)
    B_pad = n_i * tm  # padding is at most a few sublane rows per block

    x_p = x2
    if (B_pad, D_in_p) != (B, D_in):
        x_p = jnp.pad(x2, ((0, B_pad - B), (0, D_in_p - D_in)))

    need = fixed_bytes + tm * per_row_bytes + (2 << 20)
    limit = int(min(max(need + (8 << 20), 32 << 20), 56 << 20))

    y_p = pl.pallas_call(
        _linear_tiled_kernel,
        out_shape=jax.ShapeDtypeStruct((B_pad, D_out_p), out_dtype),
        grid=(n_i, n_j, n_k),
        in_specs=[
            pl.BlockSpec((tm, tk), lambda i, j, k: (i, k)),
            pl.BlockSpec((tk, tn), lambda i, j, k: (k, j)),
            pl.BlockSpec((1, tn), lambda i, j, k: (0, j)),
        ],
        out_specs=pl.BlockSpec((tm, tn), lambda i, j, k: (i, j)),
        scratch_shapes=[pltpu.VMEM((tm, tn), jnp.float32)],
        compiler_params=pltpu.CompilerParams(
            dimension_semantics=("parallel", "parallel", "arbitrary"),
            vmem_limit_bytes=limit,
        ),
        cost_estimate=cost,
    )(x_p, w_t, b_row)

    return y_p[:B, :D_out].reshape(*lead_shape, D_out)


if __name__ == "__main__":
    key = jax.random.PRNGKey(0)

    def make_params(k, hidden):
        kw, kb = jax.random.split(k)
        bound = 1.0 / (hidden ** 0.5)
        w = jax.random.uniform(kw, (hidden, hidden), jnp.float32, -bound, bound)
        b = jax.random.uniform(kb, (hidden,), jnp.float32, -bound, bound)
        return w, b

    k0, k1, k2, k3 = jax.random.split(key, 4)
    forward = jax.jit(module_with_metaclass_forward)

    # Small shape consistent with the module (square Linear, hidden=32).
    batch, hidden = 8, 32
    weight, bias = make_params(k0, hidden)
    x = jax.random.normal(k1, (batch, hidden), jnp.float32)
    y = jax.block_until_ready(forward(x, weight, bias))
    y_ref = x @ weight.T + bias
    assert y.shape == (batch, hidden)
    assert jnp.allclose(y, y_ref, atol=1e-5, rtol=1e-5), "small-path mismatch"

    # Also exercise the tiled (streamed-weight, megacore-parallel) path.
    batch2, hidden2 = 2048, 512
    weight2, bias2 = make_params(k2, hidden2)
    x2 = jax.random.normal(k3, (batch2, hidden2), jnp.float32)
    y2 = jax.block_until_ready(forward(x2, weight2, bias2))
    y2_ref = x2 @ weight2.T + bias2
    assert y2.shape == (batch2, hidden2)
    assert jnp.allclose(y2, y2_ref, atol=1e-4, rtol=1e-4), "tiled-path mismatch"

    print("KERNEL_OK")
</pallas_src>

<mosaic_0001>
module attributes {stable_mosaic.version = 11 : i64} {
  func.func @_linear_single_block_kernel(%arg0: memref<8x128xf32, #tpu.memory_space<vmem>>, %arg1: memref<128x128xf32, #tpu.memory_space<vmem>>, %arg2: memref<1x128xf32, #tpu.memory_space<vmem>>, %arg3: memref<8x128xf32, #tpu.memory_space<vmem>>) attributes {dimension_semantics = [], scalar_prefetch = 0 : i64, scratch_operands = 0 : i64, tpu.core_type = #tpu.core_type<tc>} {
    %c0 = arith.constant 0 : index
    %c0_0 = arith.constant 0 : index
    %0 = vector.load %arg0[%c0, %c0_0] : memref<8x128xf32, #tpu.memory_space<vmem>>, vector<8x128xf32>
    %c0_1 = arith.constant 0 : index
    %c0_2 = arith.constant 0 : index
    %1 = vector.load %arg1[%c0_1, %c0_2] : memref<128x128xf32, #tpu.memory_space<vmem>>, vector<128x128xf32>
    %cst = arith.constant dense<0.000000e+00> : vector<8x128xf32>
    %2 = tpu.matmul %0, %1, %cst {dimension_numbers = #tpu.dot_dimension_numbers<[1], [0], [0], [1], [0, 0, 1, 1], [], []>} : vector<8x128xf32>, vector<128x128xf32>, vector<8x128xf32> -> vector<8x128xf32>
    %c0_3 = arith.constant 0 : index
    %c0_4 = arith.constant 0 : index
    %3 = vector.load %arg2[%c0_3, %c0_4] : memref<1x128xf32, #tpu.memory_space<vmem>>, vector<1x128xf32>
    %4 = vector.broadcast %3 : vector<1x128xf32> to vector<8x128xf32>
    %5 = arith.addf %2, %4 : vector<8x128xf32>
    %c0_5 = arith.constant 0 : index
    %c0_6 = arith.constant 0 : index
    %6 = vector.load %arg3[%c0_5, %c0_6] : memref<8x128xf32, #tpu.memory_space<vmem>>, vector<8x128xf32>
    tpu.vector_store %arg3[%c0_5, %c0_6], %5 {strides = array<i32>} : memref<8x128xf32, #tpu.memory_space<vmem>>, vector<8x128xf32>,
    return
  }
}

</mosaic_0001>

<bundles_post_ra>
// kernel: module_with_metaclass_forward.1
= control target key start
LH: loop header
LB: loop body
LE: loop exit
PB: predicated region body
PF: predicated region fallthrough
CT: control target
= control target key end

     0   :  { %s179_s0 = inlined_call_operand.vmem [shape: f32[8,128], index: 0, kind: input, shape index: {}]   ;;  %s180_s1 = inlined_call_operand.vmem [shape: f32[128,128], index: 1, kind: input, shape index: {}]   ;;  %s181_s2 = inlined_call_operand.vmem [shape: f32[1,128], index: 2, kind: input, shape index: {}]   ;;  %s182_s3 = inlined_call_operand.hbm [shape: f32[8,128], index: 3, kind: output, shape index: {}]  }
   0x1   :  { %v31_v0 = vld [vmem:[%s180_s1 + $0x78] sm:$0xff]  ;;  %v30_v1 = vld [vmem:[%s180_s1 + $0x70] sm:$0xff]  ;;  %v29_v2 = vld [vmem:[%s180_s1 + $0x68] sm:$0xff] }
   0x2   :  { %36 = vmatpush.msra.mxu0 %v31_v0  ;;  %v28_v3 = vld [vmem:[%s180_s1 + $0x60] sm:$0xff]  ;;  %v27_v4 = vld [vmem:[%s180_s1 + $0x58] sm:$0xff] }
   0x4   :  { %37 = vmatpush.msra.mxu0 %v30_v1 }
   0x6   :  { %38 = vmatpush.msra.mxu0 %v29_v2 }
   0x7   :  { %8 = vsyncpa [#allocation3], 0  ;;  %v26_v5 = vld [vmem:[%s180_s1 + $0x50] sm:$0xff]  ;;  %v25_v6 = vld [vmem:[%s180_s1 + $0x48] sm:$0xff]  ;;  %s101_s21 = smov [#allocation2]   ;;  %s64_s25 = sshll.u32 %s182_s3, 4  ;;  %s65_s25 = int_to_ptr.hbm [resolvable:$true] %s64_s25 }
   0x8   :  { %39 = vmatpush.msra.mxu0 %v28_v3  ;;  %v24_v7 = vld [vmem:[%s180_s1 + $0x40] sm:$0xff]  ;;  %v23_v8 = vld [vmem:[%s180_s1 + $0x38] sm:$0xff]  ;;  %v22_v9 = vld [vmem:[%s180_s1 + $0x30] sm:$0xff]  ;;  %s62_s22 = sshll.u32 %s101_s21, 4  ;;  %s63_s22 = int_to_ptr.vmem [resolvable:$true] %s62_s22 }
   0x9   :  { %v21_v10 = vld [vmem:[%s180_s1 + $0x28] sm:$0xff]  ;;  %v20_v11 = vld [vmem:[%s180_s1 + $0x20] sm:$0xff]  ;;  %v19_v12 = vld [vmem:[%s180_s1 + $0x18] sm:$0xff] }
   0xa   :  { %40 = vmatpush.msra.mxu0 %v27_v4  ;;  %v18_v13 = vld [vmem:[%s180_s1 + $0x10] sm:$0xff]  ;;  %v17_v14 = vld [vmem:[%s180_s1 + $0x8] sm:$0xff]  ;;  %v16_v15 = vld [vmem:[%s180_s1] sm:$0xff] }
   0xb   :  { %v15_v16 = vld [vmem:[%s179_s0] sm:$0xff] }
   0xc   :  { %41 = vmatpush.msra.mxu0 %v26_v5  ;;  %v74_v17 = vld [vmem:[%s181_s2] ss:$0 sm:$0xff] }
   0xe   :  { %42 = vmatpush.msra.mxu0 %v25_v6 }
  0x10   :  { %43 = vmatpush.msra.mxu0 %v24_v7 }
  0x12   :  { %44 = vmatpush.msra.mxu0 %v23_v8 }
  0x14   :  { %45 = vmatpush.msra.mxu0 %v22_v9 }
  0x16   :  { %46 = vmatpush.msra.mxu0 %v21_v10 }
  0x18   :  { %47 = vmatpush.msra.mxu0 %v20_v11 }
  0x1a   :  { %48 = vmatpush.msra.mxu0 %v19_v12 }
  0x1c   :  { %49 = vmatpush.msra.mxu0 %v18_v13 }
  0x1e   :  { %50 = vmatpush.msra.mxu0 %v17_v14 }
  0x20   :  { %51 = vmatpush.msra.mxu0 %v16_v15 }
  0x21   :  { %52 = vmatmul.f32.vlgmr.msra.gmra.mxu0 %v15_v16 }
  0x9e   :  { %v53_v18 = vpop.f32.mrf.mxu0 }
  0x9f   :  { %v54_v19 = vadd.f32 %v74_v17, %v53_v18 }
  0xa1   :  { %56 = vst [vmem:[#allocation2] sm:$0xff] %v54_v19 }
  0xa2   :  { %67 = dma.vmem_to_hbm [thread:$0]  %s63_s22, 128, %s65_s25, [#allocation3]  }
  0xa3   :  { %99 = dma.done.wait [#allocation3], 128  }
  0xa4   :  { %100 = vsyncadd [#allocation3], 4294967168 }
  0xa5   :  { %72 = vsyncpa [#allocation3], 1 }

</bundles_post_ra>
